<compile_context>
chip_gen: v5e
topology: v5e:2x2
jax: 0.10.0
libtpu: 0.0.40
codegen_flags: <defaults>
</compile_context>

<pallas_src>
import jax
import jax.numpy as jnp
from jax.experimental import pallas as pl
from jax.experimental.pallas import tpu as pltpu

_MiB = 1024 * 1024


def _round_up(x, m):
    return ((x + m - 1) // m) * m


def _dft_basis(n_fft, n_bins, dtype):
    """(cos, -sin) real-DFT basis columns for bins 1..n_bins-1 (DC dropped)."""
    n = jnp.arange(n_fft, dtype=jnp.float32)[:, None]
    k = jnp.arange(1, n_bins, dtype=jnp.float32)[None, :]
    ang = 2.0 * jnp.pi * n * k / n_fft
    return jnp.cos(ang).astype(dtype), (-jnp.sin(ang)).astype(dtype)


def _build_frames(xp, n_frames_out, hop, n_fft):
    """(BA, L) padded signal -> (BA, n_frames_out, n_fft) overlapping frames."""
    if n_fft % hop == 0:
        ratio = n_fft // hop
        C = (n_frames_out - 1) + ratio
        chunks = xp[:, : C * hop].reshape(xp.shape[0], C, hop)
        return jnp.concatenate(
            [chunks[:, o:o + n_frames_out, :] for o in range(ratio)], axis=-1)
    idx = jnp.arange(n_frames_out)[:, None] * hop + jnp.arange(n_fft)[None, :]
    return jnp.take(xp, idx, axis=1)


def _stft_kernel(frames_ref, basis_ref, out_ref):
    # Single K-dense MXU matmul; result goes straight to the lane-dense output
    # tile (no accumulator, no in-kernel slicing/relayout).
    out_ref[...] = jnp.dot(frames_ref[...], basis_ref[...],
                           preferred_element_type=jnp.float32)


def stft_array(x, n_fft, onesided=True, compute_dtype=jnp.float32):
    """x: (batch, n_arrays, time) f32 -> (batch, n_arrays, F, n_frames) c64.

    F = n_fft//2 (onesided) or n_fft-1 (two-sided): DC bin dropped, matching
    StftArray.forward's stft_output[:, 1:, :].
    """
    B, A, T = x.shape
    BA = B * A
    hop = max(1, n_fft // 4)          # torch.stft default hop_length
    pad = n_fft // 2
    assert T > pad, "reflect padding needs time_steps > n_fft//2 (same as torch.stft)"
    n_frames = 1 + T // hop           # center=True semantics
    n_bins = (n_fft // 2 + 1) if onesided else n_fft
    F = n_bins - 1

    cosb, sinb = _dft_basis(n_fft, n_bins, jnp.float32)

    xf = x.reshape(BA, T).astype(jnp.float32)
    xp = jnp.pad(xf, ((0, 0), (pad, pad)), mode="reflect")    # (BA, T + n_fft)

    # ---- crossover: tiny n_fft -> padding waste + fixed kernel overhead dominate
    if 2 * F < 64:
        frames = _build_frames(xp, n_frames, hop, n_fft)      # (BA, NF, n_fft)
        re = jnp.einsum("bfn,nk->bfk", frames, cosb)
        im = jnp.einsum("bfn,nk->bfk", frames, sinb)
        spec = jax.lax.complex(re, im).reshape(B, A, n_frames, F)
        return jnp.transpose(spec, (0, 1, 3, 2))

    # ---- Pallas path: frames @ fused (cos | -sin) basis, one dot per tile ----
    NF_pad = _round_up(n_frames, 8)          # sublane-aligned frames per signal row
    Kd = _round_up(n_fft, 128)               # lane-dense contraction depth
    Kp = _round_up(2 * F, 128)               # lane-dense fused real|imag width
    M_total = BA * NF_pad

    # zero tail only feeds padding frames (f >= n_frames), sliced away below
    need = (NF_pad - 1) * hop + n_fft
    if need > xp.shape[1]:
        xp = jnp.pad(xp, ((0, 0), (0, need - xp.shape[1])))
    frames = _build_frames(xp, NF_pad, hop, n_fft)            # (BA, NF_pad, n_fft)
    frames = frames.reshape(M_total, n_fft)
    if Kd != n_fft:
        frames = jnp.pad(frames, ((0, 0), (0, Kd - n_fft)))
    frames = frames.astype(compute_dtype)

    basis = jnp.zeros((Kd, Kp), jnp.float32)
    basis = basis.at[:n_fft, :F].set(cosb)
    basis = basis.at[:n_fft, F:2 * F].set(sinb)
    basis = basis.astype(compute_dtype)

    # ---- per-generation VMEM budget + grid depth >= 8 (2+ steps / TensorCore) ----
    try:
        vmem_cap = pltpu.get_tpu_info().vmem_capacity_bytes
    except Exception:
        vmem_cap = 64 * _MiB
    if vmem_cap >= 128 * _MiB:               # v5e / v6e (128 MiB VMEM)
        tile_budget, vmem_limit = 48 * _MiB, 64 * _MiB
    else:                                    # v7x (64 MiB VMEM per core)
        tile_budget, vmem_limit = 20 * _MiB, 32 * _MiB

    in_bytes = jnp.dtype(compute_dtype).itemsize
    basis_bytes = Kd * Kp * in_bytes               # constant block index -> single-buffered
    per_row_bytes = 2 * Kd * in_bytes + 2 * Kp * 4  # double-buffered input + output
    # TODO(synk): for very large n_fft (>= 4096) the (Kd, Kp) basis alone nears the
    # budget; that regime wants a K-tiled reduction grid axis.
    avail = max(tile_budget - basis_bytes, 8 * per_row_bytes)
    max_tile_rows = max(8, (avail // per_row_bytes) // 8 * 8)

    GRID_TARGET = 8                                 # >= 2 pipelined steps per TC on v7x
    tile_for_grid = max(8, (M_total // GRID_TARGET) // 8 * 8)
    tile_m = max(8, min(max_tile_rows, tile_for_grid))

    M_pad = _round_up(M_total, tile_m)
    if M_pad != M_total:
        frames = jnp.pad(frames, ((0, M_pad - M_total), (0, 0)))
    grid = M_pad // tile_m

    flops = 2 * M_pad * Kd * Kp
    bytes_accessed = (M_pad * Kd + Kd * Kp) * in_bytes + M_pad * Kp * 4

    out2d = pl.pallas_call(
        _stft_kernel,
        out_shape=jax.ShapeDtypeStruct((M_pad, Kp), jnp.float32),
        grid_spec=pltpu.PrefetchScalarGridSpec(
            num_scalar_prefetch=0,
            grid=(grid,),
            in_specs=[
                pl.BlockSpec((tile_m, Kd), lambda i: (i, 0)),
                pl.BlockSpec((Kd, Kp), lambda i: (0, 0)),
            ],
            out_specs=pl.BlockSpec((tile_m, Kp), lambda i: (i, 0)),
        ),
        compiler_params=pltpu.CompilerParams(
            dimension_semantics=("parallel",),
            vmem_limit_bytes=vmem_limit,
        ),
        cost_estimate=pl.CostEstimate(
            flops=flops, transcendentals=0, bytes_accessed=bytes_accessed),
    )(frames, basis)

    # ---- epilogue: slice away all padding BEFORE any transpose (no padded bytes moved)
    out = out2d[:M_total].reshape(BA, NF_pad, Kp)
    re = out[:, :n_frames, :F].reshape(B, A, n_frames, F)
    im = out[:, :n_frames, F:2 * F].reshape(B, A, n_frames, F)
    # TODO(synk): for n_frames >= 128 the kernel could emit freq-major output
    # (frames on lanes) directly and skip this transpose entirely.
    return jax.lax.complex(jnp.transpose(re, (0, 1, 3, 2)),
                           jnp.transpose(im, (0, 1, 3, 2)))


def _reference(x, n_fft, onesided=True):
    """Pure-JAX reference (jnp.fft) mirroring torch.stft + the DC-bin drop."""
    B, A, T = x.shape
    hop = max(1, n_fft // 4)
    n_frames = 1 + T // hop
    pad = n_fft // 2
    xf = x.reshape(B * A, T).astype(jnp.float32)
    xp = jnp.pad(xf, ((0, 0), (pad, pad)), mode="reflect")
    idx = jnp.arange(n_frames)[:, None] * hop + jnp.arange(n_fft)[None, :]
    frames = xp[:, idx]
    spec = jnp.fft.rfft(frames, axis=-1) if onesided else jnp.fft.fft(frames, axis=-1)
    spec = spec[:, :, 1:].reshape(B, A, n_frames, -1)
    return jnp.transpose(spec, (0, 1, 3, 2)).astype(jnp.complex64)


def _rel_err(a, b):
    a = jnp.asarray(a, jnp.complex64).ravel()
    b = jnp.asarray(b, jnp.complex64).ravel()
    return float(jnp.linalg.norm(a - b) / (jnp.linalg.norm(b) + 1e-12))


if __name__ == "__main__":
    key = jax.random.PRNGKey(0)
    k1, k2 = jax.random.split(key)
    batch, n_arrays = 2, 4

    # ---- main case: exercises the Pallas kernel (n_fft=128, hop=32) ----
    n_fft, T = 128, 256
    X = jax.random.normal(k1, (batch, n_arrays, T), dtype=jnp.float32)
    out = jax.block_until_ready(stft_array(X, n_fft, onesided=True))
    ref = _reference(X, n_fft, onesided=True)
    assert out.shape == (batch, n_arrays, n_fft // 2, 1 + T // (n_fft // 4))
    assert out.dtype == jnp.complex64
    assert _rel_err(out, ref) < 1e-2

    # ---- bf16 inputs (halved HBM read traffic on v6e/v7x), accuracy-gated ----
    out_bf16 = jax.block_until_ready(
        stft_array(X, n_fft, onesided=True, compute_dtype=jnp.bfloat16))
    assert _rel_err(out_bf16, ref) < 3e-2

    # ---- tiny-n_fft crossover (XLA einsum path, per review) ----
    n_fft_s, T_s = 16, 64
    Xs = jax.random.normal(k2, (batch, n_arrays, T_s), dtype=jnp.float32)
    out_s = jax.block_until_ready(stft_array(Xs, n_fft_s, onesided=True))
    ref_s = _reference(Xs, n_fft_s, onesided=True)
    assert out_s.shape == (batch, n_arrays, n_fft_s // 2, 1 + T_s // (n_fft_s // 4))
    assert _rel_err(out_s, ref_s) < 1e-2

    print("KERNEL_OK")
</pallas_src>

<mosaic_0001>
module attributes {stable_mosaic.version = 11 : i64} {
  func.func @_stft_kernel(%arg0: i32, %arg1: memref<16x128xf32, #tpu.memory_space<vmem>>, %arg2: memref<128x128xf32, #tpu.memory_space<vmem>>, %arg3: memref<16x128xf32, #tpu.memory_space<vmem>>) attributes {dimension_semantics = [#tpu.dimension_semantics<parallel>], iteration_bounds = array<i64: 8>, scalar_prefetch = 0 : i64, scratch_operands = 0 : i64, tpu.core_type = #tpu.core_type<tc>, window_params = [{transform_indices = @transform_0, window_bounds = array<i64: 16, 128>}, {pipeline_mode = #tpu.pipeline_mode<synchronous>, transform_indices = @transform_1, window_bounds = array<i64: 128, 128>}, {transform_indices = @transform_2, window_bounds = array<i64: 16, 128>}]} {
    %c0 = arith.constant 0 : index
    %c0_0 = arith.constant 0 : index
    %0 = vector.load %arg1[%c0, %c0_0] : memref<16x128xf32, #tpu.memory_space<vmem>>, vector<16x128xf32>
    %c0_1 = arith.constant 0 : index
    %c0_2 = arith.constant 0 : index
    %1 = vector.load %arg2[%c0_1, %c0_2] : memref<128x128xf32, #tpu.memory_space<vmem>>, vector<128x128xf32>
    %cst = arith.constant dense<0.000000e+00> : vector<16x128xf32>
    %2 = tpu.matmul %0, %1, %cst {dimension_numbers = #tpu.dot_dimension_numbers<[1], [0], [0], [1], [0, 0, 1, 1], [], []>} : vector<16x128xf32>, vector<128x128xf32>, vector<16x128xf32> -> vector<16x128xf32>
    %c0_3 = arith.constant 0 : index
    %c0_4 = arith.constant 0 : index
    %3 = vector.load %arg3[%c0_3, %c0_4] : memref<16x128xf32, #tpu.memory_space<vmem>>, vector<16x128xf32>
    tpu.vector_store %arg3[%c0_3, %c0_4], %2 {strides = array<i32>} : memref<16x128xf32, #tpu.memory_space<vmem>>, vector<16x128xf32>,
    return
  }
  func.func @transform_0(%arg0: i32) -> (i32, i32) {
    %c0_i32 = arith.constant 0 : i32
    %c0_i32_0 = arith.constant 0 : i32
    return %arg0, %c0_i32 : i32, i32
  }
  func.func @transform_1(%arg0: i32) -> (i32, i32) {
    %c0_i32 = arith.constant 0 : i32
    %c0_i32_0 = arith.constant 0 : i32
    %c0_i32_1 = arith.constant 0 : i32
    return %c0_i32, %c0_i32_0 : i32, i32
  }
  func.func @transform_2(%arg0: i32) -> (i32, i32) {
    %c0_i32 = arith.constant 0 : i32
    %c0_i32_0 = arith.constant 0 : i32
    return %arg0, %c0_i32 : i32, i32
  }
}

</mosaic_0001>

<bundles_post_ra>
// kernel: tpu_custom_call.1
= control target key start
LH: loop header
LB: loop body
LE: loop exit
PB: predicated region body
PF: predicated region fallthrough
CT: control target
= control target key end

     0   :  { %7 = vsyncpa [#allocation3], 0  ;;  %s722_s0 = inlined_call_operand.hbm [shape: f32[128,128], index: 0, kind: input, shape index: {}]   ;;  %s723_s1 = inlined_call_operand.hbm [shape: f32[128,128], index: 1, kind: input, shape index: {}]   ;;  %s724_s2 = inlined_call_operand.hbm [shape: f32[128,128], index: 2, kind: output, shape index: {}]  }
   0x1   :  { %9 = vsyncpa [#allocation3 + $0x1], 0 }
   0x2   :  { %10 = vsyncpa [#allocation6], 0 }
   0x3   :  { %11 = vsyncpa [#allocation4], 0 }
   0x4   :  { %13 = vsyncpa [#allocation4 + $0x1], 0  ;;  %s572_s9 = smov 0   ;;  %s574_s10 = smov 0  }
   0x5   :  { %s576_s11 = smov 0   ;;  %s578_s12 = smov 0  }
   0x6 LB: > { %s593_s13 = sadd.s32 4294967295, %s550_s12   ;;  %s325_s14 = sadd.s32 4294967294, %s550_s12   ;;  %s550_s12 = sphi %s578_s12, %s733_s12   ;;  %s546_s11 = sphi %s576_s11, %s732_s11   ;;  %s542_s10 = sphi %s574_s10, %s731_s10   ;;  %s538_s9 = sphi %s572_s9, %s730_s9  }
   0x7   : > { %p39_p0 = scmp.ne.s32.totalorder %s542_s10, %s538_s9  ;;  %p40_p1 = scmp.eq.s32.totalorder %s593_s13, 0 }
   0x8   : > { %p84_p2 = scmp.eq.s32.totalorder %s593_s13, 7  ;;  %p90_p3 = scmp.eq.s32.totalorder %s325_s14, 7 }
   0x9   : > { %p602_p4 = por %p40_p1, %p39_p0  ;;  %p326_p5 = scmp.ge.s32.totalorder %s550_s12, 1 }
   0xa   : > { %p607_p6 = por %p90_p3, %p39_p0  ;;  %p97_p7 = scmp.lt.s32.totalorder %s550_s12, 9 }
   0xb   : > { %s108_s19 = sshll.u32 %s723_s1, 4  ;;  %s552_s21 = smov [#allocation5]   ;;  %s109_s19 = int_to_ptr.hbm [resolvable:$true] %s108_s19 }
   0xc   : > { %p615_p8 = pnand %p326_p5, %p97_p7  ;;  %s110_s22 = sshll.u32 %s552_s21, 4  ;;  %s111_s22 = int_to_ptr.vmem [resolvable:$true] %s110_s22 }
   0xd   : > { %s624_s23 = sadd.s32 1, %s550_s12   ;;  %s553_s24 = smov 128  }
   0xe   : > { %p367_p9 = pneg %p615_p8  ;;  %s554_s25 = smov 8  }
   0xf   : > { %s23_s26 = ssub.s32 %s550_s12, %s624_s23  ;;  %s26_s27 = sadd.s32 1, %s546_s11 }
  0x10   : > { %p368_p10 = pnand %p367_p9, %p40_p1  ;;  %p24_p11 = scmp.eq.s32.totalorder %s23_s26, 0 }
  0x11   : > { %p33_p12 = scmp.ne.s32.totalorder %s546_s11, %s542_s10  ;;  %p34_p13 = scmp.eq.s32.totalorder %s550_s12, 0 }
  0x12   : > { %370 = dma.hbm_to_vmem [thread:$0]  (!%p368_p10), %s109_s19, 2048, %s111_s22, [#allocation6], %s553_s24, %s553_s24, %s554_s25  }
  0x13   : > { %s636_s28 = scalar_select %p24_p11, %s546_s11, %s26_s27  }
  0x14   : > { %p640_p0 = por %p84_p2, %p33_p12  ;;  %p380_p3 = scmp.lt.s32.totalorder %s550_s12, 8 }
  0x15   : > { %s124_s30 = sand.u32 1, %s546_s11   ;;  %s341_s3 = sshll.u32 %s550_s12, 4 }
  0x16   : > { %p35_p5 = por %p34_p13, %p33_p12  ;;  %s329_s4 = sshll.u32 %s124_s30, 4 }
  0x17   : > { %s133_s7 = scalar_lea.hbm %s722_s0, %s341_s3  ;;  %s128_s14 = scalar_lea.vmem [#allocation2], %s329_s4 }
  0x18   : > { %s134_s8 = sshll.u32 %s133_s7, 4  ;;  %s136_s17 = sshll.u32 %s128_s14, 4  ;;  %s135_s8 = int_to_ptr.hbm [resolvable:$true] %s134_s8  ;;  %s137_s17 = int_to_ptr.vmem [resolvable:$true] %s136_s17 }
  0x19   : > { %p650_p7 = pnand %p380_p3, %p35_p5  ;;  %s125_s19 = scalar_lea.sflag [#allocation3], %s124_s30 }
  0x1a   : > { %s450_s21 = sshra.s32 %s135_s8, 4  ;;  %s457_s3 = scalar_lea.hbm %s722_s0, 128  ;;  %s451_s21 = int_to_ptr.hbm [resolvable:$true] %s450_s21 }
  0x1b   : > { %s452_s22 = scalar_lea.hbm %s451_s21, 16  ;;  %p454_p9 = pneg %p650_p7 }
  0x1c   : > { %p453_p2 = scmp.ne.s32.totalorder %s451_s21, %s452_s22  ;;  %p458_p12 = scmp.lt.s32.totalorder %s451_s21, %s722_s0 }
  0x1d   : > { %p459_p13 = scmp.lt.s32.totalorder %s457_s3, %s452_s22 }
  0x1e   : > { %p455_p10 = pnand %p454_p9, %p453_p2 }
  0x1f   : > { %p460_p3 = por %p459_p13, %p458_p12 }
  0x20   : > { %p456_p11 = pneg %p455_p10 }
  0x22   : > { %p461_p5 = pnand %p460_p3, %p456_p11 }
  0x24   : > { %464 = shalt.err (!%p461_p5)
}
  0x25   : > { %374 = dma.hbm_to_vmem [thread:$0]  (!%p650_p7), %s135_s8, 256, %s137_s17, %s125_s19, %s553_s24, %s553_s24, %s554_s25  }
  0x26   : > { %148 = sbr.rel (%p615_p8) target bundleno = 209 (0xd1), region = 28  ;;  %s670_s30 = sand.u32 (!%p615_p8), 1, %s542_s10  }
  0x27   : > { %s333_s6 = sshll.u32 (!%p615_p8), %s670_s30, 4  ;;  %s151_s7 = scalar_lea.sflag (!%p615_p8), [#allocation3], %s670_s30 }
  0x28   : > { %s676_s14 = scalar_lea.vmem (!%p615_p8), [#allocation2], %s333_s6 }
  0x2b   : > { %525 = dma.done.wait (%p602_p4), %s151_s7, 256  }
  0x2c   : > { %527 = vsyncadd (%p602_p4), %s151_s7, 4294967040 }
  0x2d   : > { %529 = dma.done.wait (%p40_p1), [#allocation6], 2048  }
  0x2e   : > { %531 = vsyncadd (%p40_p1), [#allocation6], 4294965248  ;;  %v200_v0 = vld [vmem:[#allocation5 + $0x78] sm:$0xff]  ;;  %v199_v1 = vld [vmem:[#allocation5 + $0x70] sm:$0xff]  ;;  %s342_s15 = sshll.u32 %s593_s13, 4  ;;  %s180_s8 = scalar_lea.vmem [#allocation7], %s333_s6 }
  0x2f   : > { %201 = vmatpush.msra.mxu0 %v200_v0  ;;  %343 = vmatpush.msra.mxu1 %v200_v0  ;;  %v198_v2 = vld [vmem:[#allocation5 + $0x68] sm:$0xff]  ;;  %v197_v3 = vld [vmem:[#allocation5 + $0x60] sm:$0xff]  ;;  %v196_v4 = vld [vmem:[#allocation5 + $0x58] sm:$0xff]  ;;  %s238_s25 = scalar_lea.hbm %s724_s2, %s342_s15  ;;  %s239_s17 = sshll.u32 %s180_s8, 4  ;;  %s240_s17 = int_to_ptr.vmem [resolvable:$true] %s239_s17 }
  0x30   : > { %v195_v5 = vld [vmem:[#allocation5 + $0x50] sm:$0xff]  ;;  %v194_v6 = vld [vmem:[#allocation5 + $0x48] sm:$0xff]  ;;  %v193_v7 = vld [vmem:[#allocation5 + $0x40] sm:$0xff]  ;;  %s241_s18 = sshll.u32 %s238_s25, 4  ;;  %s227_s19 = scalar_lea.sflag [#allocation4], %s670_s30  ;;  %s242_s18 = int_to_ptr.hbm [resolvable:$true] %s241_s18 }
  0x31   : > { %202 = vmatpush.msra.mxu0 %v199_v1  ;;  %344 = vmatpush.msra.mxu1 %v199_v1  ;;  %v192_v8 = vld [vmem:[#allocation5 + $0x38] sm:$0xff]  ;;  %v191_v9 = vld [vmem:[#allocation5 + $0x30] sm:$0xff]  ;;  %v190_v10 = vld [vmem:[#allocation5 + $0x28] sm:$0xff]  ;;  %s494_s21 = sshra.s32 %s242_s18, 4  ;;  %s500_s27 = scalar_lea.hbm %s724_s2, 128  ;;  %s495_s21 = int_to_ptr.hbm [resolvable:$true] %s494_s21 }
  0x32   : > { %v189_v11 = vld [vmem:[#allocation5 + $0x20] sm:$0xff]  ;;  %v188_v12 = vld [vmem:[#allocation5 + $0x18] sm:$0xff]  ;;  %v187_v13 = vld [vmem:[#allocation5 + $0x10] sm:$0xff]  ;;  %s496_s22 = scalar_lea.hbm %s495_s21, 16  ;;  %p501_p7 = scmp.lt.s32.totalorder %s495_s21, %s724_s2 }
  0x33   : > { %203 = vmatpush.msra.mxu0 %v198_v2  ;;  %345 = vmatpush.msra.mxu1 %v198_v2  ;;  %v186_v14 = vld [vmem:[#allocation5 + $0x8] sm:$0xff]  ;;  %v185_v15 = vld [vmem:[#allocation5] sm:$0xff]  ;;  %p497_p1 = scmp.ne.s32.totalorder %s495_s21, %s496_s22  ;;  %p502_p2 = scmp.lt.s32.totalorder %s500_s27, %s496_s22 }
  0x34   : > { %v183_v16 = vld [vmem:[%s676_s14] sm:$0xff]  ;;  %v184_v17 = vld [vmem:[%s676_s14 + $0x8] sm:$0xff] }
  0x35   : > { %204 = vmatpush.msra.mxu0 %v197_v3  ;;  %346 = vmatpush.msra.mxu1 %v197_v3  ;;  %p498_p4 = pnand %p497_p1, %p640_p0  ;;  %p503_p9 = por %p502_p2, %p501_p7 }
  0x37   : > { %205 = vmatpush.msra.mxu0 %v196_v4  ;;  %347 = vmatpush.msra.mxu1 %v196_v4  ;;  %p499_p8 = pneg %p498_p4 }
  0x39   : > { %206 = vmatpush.msra.mxu0 %v195_v5  ;;  %348 = vmatpush.msra.mxu1 %v195_v5  ;;  %p504_p10 = pnand %p503_p9, %p499_p8 }
  0x3b   : > { %207 = vmatpush.msra.mxu0 %v194_v6  ;;  %349 = vmatpush.msra.mxu1 %v194_v6 }
  0x3d   : > { %208 = vmatpush.msra.mxu0 %v193_v7  ;;  %350 = vmatpush.msra.mxu1 %v193_v7 }
  0x3f   : > { %209 = vmatpush.msra.mxu0 %v192_v8  ;;  %351 = vmatpush.msra.mxu1 %v192_v8 }
  0x41   : > { %210 = vmatpush.msra.mxu0 %v191_v9  ;;  %352 = vmatpush.msra.mxu1 %v191_v9 }
  0x43   : > { %211 = vmatpush.msra.mxu0 %v190_v10  ;;  %353 = vmatpush.msra.mxu1 %v190_v10 }
  0x45   : > { %212 = vmatpush.msra.mxu0 %v189_v11  ;;  %354 = vmatpush.msra.mxu1 %v189_v11 }
  0x47   : > { %213 = vmatpush.msra.mxu0 %v188_v12  ;;  %355 = vmatpush.msra.mxu1 %v188_v12 }
  0x49   : > { %214 = vmatpush.msra.mxu0 %v187_v13  ;;  %356 = vmatpush.msra.mxu1 %v187_v13 }
  0x4b   : > { %215 = vmatpush.msra.mxu0 %v186_v14  ;;  %357 = vmatpush.msra.mxu1 %v186_v14 }
  0x4d   : > { %216 = vmatpush.msra.mxu0 %v185_v15  ;;  %358 = vmatpush.msra.mxu1 %v185_v15 }
  0x4e   : > { %217 = vmatmul.f32.vlgmr.msra.gmra.mxu0 %v183_v16  ;;  %220 = vmatmul.f32.vlgmr.msra.gmra.mxu1 %v184_v17 }
  0xcb   : > { %v218_v18 = vpop.f32.mrf.mxu0  ;;  %v221_v19 = vpop.f32.mrf.mxu1 }
  0xcc   : > { %224 = vst [vmem:[%s180_s8] sm:$0xff] %v218_v18 }
  0xcd   : > { %225 = vst [vmem:[%s180_s8 + $0x8] sm:$0xff] %v221_v19 }
  0xce   : > { %507 = shalt.err (!%p504_p10)
}
  0xcf   : > { %s555_s5 = smov 128   ;;  %s556_s30 = smov 8  }
  0xd0   : > { %365 = dma.vmem_to_hbm [thread:$0]  (%p640_p0), %s240_s17, 256, %s242_s18, %s227_s19, %s555_s5, %s555_s5, %s556_s30  }
  0xd1 PF: > { %p382_p11 = scmp.ge.s32.totalorder %s550_s12, 2  ;;  %s256_s6 = sand.u32 1, %s538_s9  }
  0xd2   : > { %s257_s7 = scalar_lea.sflag [#allocation4], %s256_s6 }
  0xd3   : > { %p376_p12 = pnand %p382_p11, %p607_p6 }
  0xd5   : > { %p377_p13 = pneg %p376_p12 }
  0xd7   : > { %533 = dma.done.wait (%p377_p13), %s257_s7, 256  }
  0xd8   : > { %535 = vsyncadd (%p377_p13), %s257_s7, 4294967040  ;;  %p16_p3 = scmp.ge.s32.totalorder %s624_s23, 10   ;;  %s730_s9 = smov %s542_s10 }
  0xd9   : > { %s731_s10 = smov %s546_s11  ;;  %s732_s11 = smov %s636_s28 }
  0xda   : > { %s733_s12 = smov %s624_s23  ;;  %18 = sbr.rel (!%p16_p3) target bundleno = 6 (0x6), region = 77 }
  0xdf   :  { %263 = vsyncpa [#allocation3], 1 }
  0xe0   :  { %265 = vsyncpa [#allocation3 + $0x1], 1 }
  0xe1   :  { %266 = vsyncpa [#allocation6], 1 }
  0xe2   :  { %267 = vsyncpa [#allocation4], 1 }
  0xe3   :  { %269 = vsyncpa [#allocation4 + $0x1], 1 }

</bundles_post_ra>
